<compile_context>
chip_gen: v5e
topology: v5e:2x2
jax: 0.10.0
libtpu: 0.0.40
codegen_flags: <defaults>
</compile_context>

<pallas_src>
import math

import jax
import jax.numpy as jnp
from jax.experimental import pallas as pl
from jax.experimental.pallas import tpu as pltpu


def _drop_path_kernel(factor_ref, x_ref, o_ref):
    # factor_ref: SMEM (B,) float32 per-sample scale factors (whole array).
    # x_ref / o_ref: VMEM (1, TILE_M, L) lane-dense tile of sample b.
    b = pl.program_id(0)
    # float32 factor promotes the multiply; cast back to the output dtype.
    o_ref[...] = (x_ref[...] * factor_ref[b]).astype(o_ref.dtype)


def _pick_lane_dense_L(T):
    """Largest multiple-of-128 chunk length that divides T, else None."""
    for L in (1024, 512, 256, 128):
        if T % L == 0:
            return L
    return None


def drop_path(x, *, drop_prob=0.0, training=False, key=None):
    """Pallas implementation of DropPath.forward.

    Semantics match the PyTorch module:
      - drop_prob == 0 (or not training)  -> identity
      - otherwise: per-sample binary mask = floor(keep_prob + U[0,1)),
        output = x / keep_prob * mask  (mask broadcast over non-batch dims).
    """
    if drop_prob == 0.0 or not training:
        # Identity: skip the kernel entirely (saves a full HBM read + write).
        return x

    if not (0.0 < drop_prob < 1.0):
        raise ValueError("drop_prob must be in [0, 1) when training")
    if key is None:
        raise ValueError("drop_path needs a PRNG key when training with drop_prob > 0")

    keep_prob = 1.0 - drop_prob
    B = x.shape[0]
    # Per-sample factor in float32 regardless of x dtype (avoids bf16 rounding
    # of keep_prob + u, floor, and 1/keep_prob).
    u = jax.random.uniform(key, (B,), dtype=jnp.float32)
    mask = jnp.floor(jnp.float32(keep_prob) + u)   # bernoulli(keep_prob), torch-style
    factor = mask / jnp.float32(keep_prob)         # (B,) float32

    orig_shape = x.shape
    T = math.prod(orig_shape[1:])

    L = _pick_lane_dense_L(T)
    if L is None:
        # TODO(synk): trailing sizes not divisible by 128 fall back to one
        # (1, 1, T) block per sample (masked partial stores on the last dim).
        M, L, tile_m = 1, T, 1
    else:
        M = T // L
        # ~2 MiB per block: >=512-wide lane-dense tiles sit near the HBM
        # roofline, while in+out double-buffering stays well under v7x's
        # 64 MiB VMEM and v5e's 16 MiB default scoped limit.
        itemsize = x.dtype.itemsize
        target_rows = max(1, (2 * 1024 * 1024) // (L * itemsize))
        if target_rows >= M:
            tile_m = M
        else:
            tile_m = max(8, (target_rows // 8) * 8)  # keep sublane-aligned

    x2 = x.reshape(B, M, L)
    grid = (B, pl.cdiv(M, tile_m))

    out = pl.pallas_call(
        _drop_path_kernel,
        out_shape=jax.ShapeDtypeStruct((B, M, L), x.dtype),
        grid=grid,
        in_specs=[
            # (B,) float32 factors live whole in SMEM; no scalar prefetch
            # needed since they never feed an index_map.
            pl.BlockSpec(memory_space=pltpu.MemorySpace.SMEM),
            pl.BlockSpec((1, tile_m, L), lambda b, t: (b, t, 0)),
        ],
        out_specs=pl.BlockSpec((1, tile_m, L), lambda b, t: (b, t, 0)),
        compiler_params=pltpu.CompilerParams(
            dimension_semantics=("parallel", "parallel")),
    )(factor, x2)
    return out.reshape(orig_shape)


def _drop_path_ref(x, factor):
    # pure-JAX reference, given the same per-sample float32 factors
    return (x * factor.reshape((x.shape[0],) + (1,) * (x.ndim - 1))).astype(x.dtype)


if __name__ == "__main__":
    key = jax.random.PRNGKey(0)
    k_x, k_mask, k_x2 = jax.random.split(key, 3)

    # Swin-like token layout: (batch, tokens, channels)
    B, N, C = 2, 8, 96
    x = jax.random.normal(k_x, (B, N, C), dtype=jnp.float32)

    # Case 1: drop_prob == 0 (module defaults) -> identity, no kernel launch.
    out_id = jax.block_until_ready(drop_path(x, drop_prob=0.0, training=False))
    assert jnp.array_equal(out_id, x), "identity path mismatch"

    # Case 2: training with drop_prob > 0 -> per-sample scaled mask
    # (lane-dense reshape path: N*C = 768 -> (B, 3, 256)).
    drop_prob = 0.25
    keep_prob = 1.0 - drop_prob
    u = jax.random.uniform(k_mask, (B,), dtype=jnp.float32)
    factor = jnp.floor(jnp.float32(keep_prob) + u) / jnp.float32(keep_prob)
    ref = _drop_path_ref(x, factor)
    out_drop = jax.block_until_ready(
        drop_path(x, drop_prob=drop_prob, training=True, key=k_mask))
    assert jnp.allclose(out_drop, ref, atol=1e-6, rtol=1e-6), "drop path mismatch"

    # Case 3: odd trailing shape (7*33 = 231, not a multiple of 128) exercises
    # the fallback single-block-per-sample path.
    x_odd = jax.random.normal(k_x2, (B, 7, 33), dtype=jnp.float32)
    ref_odd = _drop_path_ref(x_odd, factor)
    out_odd = jax.block_until_ready(
        drop_path(x_odd, drop_prob=drop_prob, training=True, key=k_mask))
    assert jnp.allclose(out_odd, ref_odd, atol=1e-6, rtol=1e-6), "fallback path mismatch"

    print("KERNEL_OK")
</pallas_src>

<mosaic_0001>
module attributes {stable_mosaic.version = 11 : i64} {
  func.func @_drop_path_kernel(%arg0: i32, %arg1: i32, %arg2: memref<2xf32, #tpu.memory_space<smem>>, %arg3: memref<1x3x256xf32, #tpu.memory_space<vmem>>, %arg4: memref<1x3x256xf32, #tpu.memory_space<vmem>>) attributes {dimension_semantics = [#tpu.dimension_semantics<parallel>, #tpu.dimension_semantics<parallel>], iteration_bounds = array<i64: 2, 1>, scalar_prefetch = 0 : i64, scratch_operands = 0 : i64, tpu.core_type = #tpu.core_type<tc>, window_params = [{transform_indices = @transform_0, window_bounds = array<i64: 2>}, {transform_indices = @transform_1, window_bounds = array<i64: 1, 3, 256>}, {transform_indices = @transform_2, window_bounds = array<i64: 1, 3, 256>}]} {
    %c0 = arith.constant 0 : index
    %c0_0 = arith.constant 0 : index
    %c0_1 = arith.constant 0 : index
    %0 = vector.load %arg3[%c0, %c0_0, %c0_1] : memref<1x3x256xf32, #tpu.memory_space<vmem>>, vector<1x3x256xf32>
    %1 = arith.index_cast %arg0 : i32 to index
    %2 = memref.load %arg2[%1] : memref<2xf32, #tpu.memory_space<smem>>
    %3 = vector.broadcast %2 : f32 to vector<1x3x256xf32>
    %4 = arith.mulf %0, %3 : vector<1x3x256xf32>
    %c0_2 = arith.constant 0 : index
    %c0_3 = arith.constant 0 : index
    %c0_4 = arith.constant 0 : index
    %5 = vector.load %arg4[%c0_2, %c0_3, %c0_4] : memref<1x3x256xf32, #tpu.memory_space<vmem>>, vector<1x3x256xf32>
    tpu.vector_store %arg4[%c0_2, %c0_3, %c0_4], %4 {strides = array<i32>} : memref<1x3x256xf32, #tpu.memory_space<vmem>>, vector<1x3x256xf32>,
    return
  }
  func.func @transform_0(%arg0: i32, %arg1: i32) -> i32 {
    %c0_i32 = arith.constant 0 : i32
    %c0_i32_0 = arith.constant 0 : i32
    return %c0_i32 : i32
  }
  func.func @transform_1(%arg0: i32, %arg1: i32) -> (i32, i32, i32) {
    %c0_i32 = arith.constant 0 : i32
    %c0_i32_0 = arith.constant 0 : i32
    return %arg0, %arg1, %c0_i32 : i32, i32, i32
  }
  func.func @transform_2(%arg0: i32, %arg1: i32) -> (i32, i32, i32) {
    %c0_i32 = arith.constant 0 : i32
    %c0_i32_0 = arith.constant 0 : i32
    return %arg0, %arg1, %c0_i32 : i32, i32, i32
  }
}

</mosaic_0001>

<bundles_post_ra>
// kernel: tpu_custom_call.1
= control target key start
LH: loop header
LB: loop body
LE: loop exit
PB: predicated region body
PF: predicated region fallthrough
CT: control target
= control target key end

     0   :  { %7 = vsyncpa [#allocation3], 0  ;;  %s413_s9 = smov 0   ;;  %s415_s10 = smov 0   ;;  %s447_s0 = inlined_call_operand.vmem [shape: f32[2], index: 0, kind: input, shape index: {}]   ;;  %s448_s1 = inlined_call_operand.vmem [shape: f32[2,3,256], index: 1, kind: input, shape index: {}]   ;;  %s449_s2 = inlined_call_operand.vmem [shape: f32[2,3,256], index: 2, kind: output, shape index: {}]  }
   0x1   :  { %s417_s11 = smov 0  }
   0x2 LB: > { %s304_s12 = sadd.s32 4294967295, %s395_s11   ;;  %s25_s13 = sadd.s32 1, %s391_s10  ;;  %s395_s11 = sphi %s417_s11, %s13_s11   ;;  %s391_s10 = sphi %s415_s10, %s451_s10   ;;  %s387_s9 = sphi %s413_s9, %s450_s9  }
   0x3   : > { %p27_p0 = scmp.ge.s32.totalorder %s25_s13, 2  ;;  %p306_p1 = scmp.ge.s32.totalorder %s395_s11, 1 }
   0x4   : > { %p107_p2 = scmp.lt.s32.totalorder %s395_s11, 3  ;;  %p327_p4 = scmp.eq.s32.totalorder %s304_s12, 0 }
   0x5   : > { %s453_s13 = smov (%p27_p0, %s25_s13), 0  ;;  %s119_s16 = sshll.u32 %s447_s0, 4  ;;  %s120_s16 = int_to_ptr.vmem [resolvable:$true] %s119_s16 }
   0x6   : > { %p108_p3 = pnand %p306_p1, %p107_p2  ;;  %s397_s17 = smov [#allocation2]  }
   0x8   : > { %p323_p5 = pneg %p108_p3  ;;  %144 = sbr.rel (%p108_p3) target bundleno = 26 (0x1a), region = 28 }
   0xa   : > { %p324_p6 = pnand %p327_p4, %p323_p5 }
   0xc   : > { %326 = dma.vmem_to_smem (!%p324_p6), %s120_s16, 16, %s397_s17, [#allocation3]  }
   0xd   : > { %382 = dma.done.wait (%p327_p4), [#allocation3], 16  }
   0xe   : > { %384 = vsyncadd (%p327_p4), [#allocation3], 4294967280 }
   0xf   : > { %151 = sfence }
  0x10   : > { %p176_p7 = scmp.lt.s32.totalorder %s387_s9, 1  ;;  %s195_s18 = sld [smem:[#allocation2 + %s387_s9]] }
  0x12   : > { %s455_s9 = smov (!%p176_p7, %s387_s9), 1 }
  0x13   : > { %s317_s19 = sshll.u32 %s455_s9, 3 }
  0x14   : > { %s184_s22 = scalar_lea.vmem %s448_s1, %s317_s19  ;;  %s193_s25 = scalar_lea.vmem %s449_s2, %s317_s19 }
  0x15   : > { %v194_v0 = vld [vmem:[%s184_s22] sm:$0x77] }
  0x16   : > { %v196_v1 = vstv %s195_s18 }
  0x17   : > { %v197_v2 = vmul.f32 %v196_v1, %v194_v0 }
  0x19   : > { %198 = vst [vmem:[%s193_s25] sm:$0x77] %v197_v2 }
  0x1a PF: > { %s13_s11 = sadd.s32 1, %s395_s11   ;;  %s450_s9 = smov %s391_s10 }
  0x1b   : > { %p10_p8 = scmp.ge.s32.totalorder %s13_s11, 4   ;;  %s451_s10 = smov %s453_s13 }
  0x1d   :  { %12 = sbr.rel (!%p10_p8) target bundleno = 2 (0x2), region = 63 }
  0x22   :  { %228 = vsyncpa [#allocation3], 1 }
  0x23   :  { %230 = vsyncpa [#allocation3 + $0x1], 1 }

</bundles_post_ra>
